<compile_context>
chip_gen: v7x
topology: tpu7x:2x2x1
jax: 0.10.0
libtpu: 0.0.40
codegen_flags: <defaults>
</compile_context>

<pallas_src>
import functools

import jax
import jax.numpy as jnp
from jax.experimental import pallas as pl
from jax.experimental.pallas import tpu as pltpu


def _decoder_kernel(x1_ref, x2_ref, w_ref, b_ref, o_ref, *, c1, c2, cout):
    # x1_ref : (nb, C1, TM)  VMEM tile of x1 (channel-first, spatial lane-dense)
    # x2_ref : (nb, C2, TM)  VMEM tile of x2
    # w_ref  : (Cout, C1+C2) SMEM, f32, weight-normalized 1x1-conv weight
    # b_ref  : (Cout,)       SMEM, f32, bias
    # o_ref  : (nb, Cout, TM)
    # Pure VPU broadcast-FMA (the 8-wide contraction would be almost all MXU padding).
    x1 = x1_ref[...].astype(jnp.float32)
    x2 = x2_ref[...].astype(jnp.float32)
    for co in range(cout):
        acc = w_ref[co, 0] * x1[:, 0, :]
        for ci in range(1, c1):
            acc = acc + w_ref[co, ci] * x1[:, ci, :]
        for ci in range(c2):
            acc = acc + w_ref[co, c1 + ci] * x2[:, ci, :]
        acc = acc + b_ref[co]
        o_ref[:, co, :] = acc.astype(o_ref.dtype)


_VMEM_BUDGET = 24 * 1024 * 1024  # per-step double-buffered footprint target (safe on v7x)


def _padded_rows(c, itemsize):
    """Channel rows after sublane padding (granule 8 for 4B, 16 for 2B dtypes)."""
    granule = max(8, 32 // itemsize)
    return ((c + granule - 1) // granule) * granule


def _choose_tiles(n, hw, itemsize, c1, c2, cout, vmem_budget):
    """Pick (nb, tm): batch-fold and spatial tile under an explicit VMEM budget."""
    # bytes per (batch, lane) column across the three live arrays, with sublane padding
    col_bytes = (_padded_rows(c1, itemsize) + _padded_rows(c2, itemsize)
                 + _padded_rows(cout, itemsize)) * itemsize
    # x2 for double buffering: nb * tm <= budget / (2 * col_bytes)
    max_elems = max(128, vmem_budget // (2 * col_bytes))
    if hw <= max_elems:
        tm = hw                                           # full-dim block: always layout-legal
        nb = max(1, min(n, max_elems // max(tm, 1)))      # fold batch to fill the budget
    else:
        tm = max(128, (max_elems // 128) * 128)           # 128-multiple tile, ragged last block
        nb = 1
    # Keep >= 2 grid steps along a "parallel" axis so both v7x TensorCores get work.
    steps = pl.cdiv(n, nb) * pl.cdiv(hw, tm)
    if steps < 2:
        if n >= 2:
            nb = pl.cdiv(n, 2)
        elif hw >= 256:
            tm = max(128, (pl.cdiv(hw, 2) // 128) * 128)
    return nb, tm


@jax.jit
def mixer_cell_decoder(x1, x2, v, g, b):
    """x1:(N,C1,H,W), x2:(N,C2,H,W), v:(Cout,Cin), g:(Cout,), b:(Cout,) -> (N,Cout,H,W)."""
    n, c1, h, w_ = x1.shape
    c2 = x2.shape[1]
    cout = v.shape[0]
    hw = h * w_
    itemsize = jnp.dtype(x1.dtype).itemsize

    # Weight normalization ONCE (tiny (Cout, Cin) op), kept in f32 regardless of input
    # dtype so bf16 activations don't quantize the normalized weight.
    vf = v.astype(jnp.float32)
    norm = jnp.sqrt(jnp.sum(vf * vf, axis=1, keepdims=True))           # (Cout, 1)
    w = vf * (g.astype(jnp.float32).reshape(-1, 1) / norm)             # (Cout, Cin) f32
    bf = b.astype(jnp.float32)                                         # (Cout,)     f32

    # Free, contiguous reshapes: channel-first, spatial flattened and lane-dense.
    x1f = x1.reshape(n, c1, hw)
    x2f = x2.reshape(n, c2, hw)

    nb, tm = _choose_tiles(n, hw, itemsize, c1, c2, cout, _VMEM_BUDGET)
    grid = (pl.cdiv(n, nb), pl.cdiv(hw, tm))

    # Explicit VMEM limit from the padded-sublane, double-buffered estimate (+ headroom),
    # capped well below v7x's 64 MiB physical VMEM.
    block_bytes = nb * tm * itemsize * (
        _padded_rows(c1, itemsize) + _padded_rows(c2, itemsize) + _padded_rows(cout, itemsize))
    vmem_limit = int(min(48 << 20, max(2 * block_bytes + (4 << 20), 16 << 20)))

    cost = pl.CostEstimate(
        flops=2 * (c1 + c2) * cout * n * hw,
        transcendentals=0,
        bytes_accessed=(c1 + c2 + cout) * n * hw * itemsize
        + (cout * (c1 + c2) + cout) * 4,
    )

    kernel = functools.partial(_decoder_kernel, c1=c1, c2=c2, cout=cout)

    out_flat = pl.pallas_call(
        kernel,
        out_shape=jax.ShapeDtypeStruct((n, cout, hw), x1.dtype),
        grid_spec=pltpu.PrefetchScalarGridSpec(
            num_scalar_prefetch=0,
            grid=grid,
            in_specs=[
                pl.BlockSpec((nb, c1, tm), lambda bi, si: (bi, 0, si)),
                pl.BlockSpec((nb, c2, tm), lambda bi, si: (bi, 0, si)),
                pl.BlockSpec(memory_space=pltpu.MemorySpace.SMEM),  # normalized W (Cout, Cin)
                pl.BlockSpec(memory_space=pltpu.MemorySpace.SMEM),  # bias (Cout,)
            ],
            out_specs=pl.BlockSpec((nb, cout, tm), lambda bi, si: (bi, 0, si)),
        ),
        compiler_params=pltpu.CompilerParams(
            dimension_semantics=("parallel", "parallel"),
            vmem_limit_bytes=vmem_limit,
        ),
        cost_estimate=cost,
    )(x1f, x2f, w, bf)

    return out_flat.reshape(n, cout, h, w_)


def _reference(x1, x2, v, g, b):
    y = jnp.concatenate([x1, x2], axis=1)                              # (N, Cin, H, W)
    norm = jnp.sqrt(jnp.sum(v * v, axis=1, keepdims=True))             # (Cout, 1)
    w = v * (g.reshape(-1, 1) / norm)                                  # (Cout, Cin)
    return jnp.einsum("nchw,oc->nohw", y, w) + b.reshape(1, -1, 1, 1)


if __name__ == "__main__":
    key = jax.random.PRNGKey(0)
    k1, k2, kv, kg, kb = jax.random.split(key, 5)

    # small shapes: batch=2, in_channels1=4, in_channels2=4, spatial=16x16
    N, C1, C2, H, W = 2, 4, 4, 16, 16
    Cin, Cout = C1 + C2, C1  # Conv2d(out_channels=in_channels1)

    x1 = jax.random.normal(k1, (N, C1, H, W), jnp.float32)
    x2 = jax.random.normal(k2, (N, C2, H, W), jnp.float32)

    # weight-norm parameterization of the 1x1 conv (kernel_size=1 dims squeezed):
    v = jax.random.normal(kv, (Cout, Cin), jnp.float32) * 0.1
    g = jax.random.uniform(kg, (Cout,), jnp.float32, 0.5, 1.5)
    b = jax.random.uniform(kb, (Cout,), jnp.float32, -0.1, 0.1)

    out = mixer_cell_decoder(x1, x2, v, g, b)
    out = jax.block_until_ready(out)

    ref = _reference(x1, x2, v, g, b)
    assert out.shape == (N, Cout, H, W)
    assert jnp.allclose(out, ref, atol=1e-5, rtol=1e-5), "mismatch vs reference"

    print("KERNEL_OK")
</pallas_src>

<mosaic_0001>
module attributes {stable_mosaic.version = 11 : i64} {
  func.func @_decoder_kernel(%arg0: i32, %arg1: i32, %arg2: memref<1x4x256xf32, #tpu.memory_space<vmem>>, %arg3: memref<1x4x256xf32, #tpu.memory_space<vmem>>, %arg4: memref<4x8xf32, #tpu.memory_space<smem>>, %arg5: memref<4xf32, #tpu.memory_space<smem>>, %arg6: memref<1x4x256xf32, #tpu.memory_space<vmem>>) attributes {dimension_semantics = [#tpu.dimension_semantics<parallel>, #tpu.dimension_semantics<parallel>], iteration_bounds = array<i64: 2, 1>, scalar_prefetch = 0 : i64, scratch_operands = 0 : i64, tpu.core_type = #tpu.core_type<tc>, window_params = [{transform_indices = @transform_0, window_bounds = array<i64: 1, 4, 256>}, {transform_indices = @transform_1, window_bounds = array<i64: 1, 4, 256>}, {transform_indices = @transform_2, window_bounds = array<i64: 4, 8>}, {transform_indices = @transform_3, window_bounds = array<i64: 4>}, {transform_indices = @transform_4, window_bounds = array<i64: 1, 4, 256>}]} {
    %c0 = arith.constant 0 : index
    %c0_0 = arith.constant 0 : index
    %c0_1 = arith.constant 0 : index
    %0 = vector.load %arg2[%c0, %c0_0, %c0_1] : memref<1x4x256xf32, #tpu.memory_space<vmem>>, vector<1x4x256xf32>
    %c0_2 = arith.constant 0 : index
    %c0_3 = arith.constant 0 : index
    %c0_4 = arith.constant 0 : index
    %1 = vector.load %arg3[%c0_2, %c0_3, %c0_4] : memref<1x4x256xf32, #tpu.memory_space<vmem>>, vector<1x4x256xf32>
    %c0_5 = arith.constant 0 : index
    %c0_6 = arith.constant 0 : index
    %2 = memref.load %arg4[%c0_5, %c0_6] : memref<4x8xf32, #tpu.memory_space<smem>>
    %3 = vector.extract_strided_slice %0 {offsets = [0, 0, 0], sizes = [1, 1, 256], strides = [1, 1, 1]} : vector<1x4x256xf32> to vector<1x1x256xf32>
    %4 = vector.shape_cast %3 : vector<1x1x256xf32> to vector<1x256xf32>
    %5 = vector.broadcast %2 : f32 to vector<1x256xf32>
    %6 = arith.mulf %5, %4 : vector<1x256xf32>
    %c0_7 = arith.constant 0 : index
    %c1 = arith.constant 1 : index
    %7 = memref.load %arg4[%c0_7, %c1] : memref<4x8xf32, #tpu.memory_space<smem>>
    %8 = vector.extract_strided_slice %0 {offsets = [0, 1, 0], sizes = [1, 1, 256], strides = [1, 1, 1]} : vector<1x4x256xf32> to vector<1x1x256xf32>
    %9 = vector.shape_cast %8 : vector<1x1x256xf32> to vector<1x256xf32>
    %10 = vector.broadcast %7 : f32 to vector<1x256xf32>
    %11 = arith.mulf %10, %9 : vector<1x256xf32>
    %12 = arith.addf %6, %11 : vector<1x256xf32>
    %c0_8 = arith.constant 0 : index
    %c2 = arith.constant 2 : index
    %13 = memref.load %arg4[%c0_8, %c2] : memref<4x8xf32, #tpu.memory_space<smem>>
    %14 = vector.extract_strided_slice %0 {offsets = [0, 2, 0], sizes = [1, 1, 256], strides = [1, 1, 1]} : vector<1x4x256xf32> to vector<1x1x256xf32>
    %15 = vector.shape_cast %14 : vector<1x1x256xf32> to vector<1x256xf32>
    %16 = vector.broadcast %13 : f32 to vector<1x256xf32>
    %17 = arith.mulf %16, %15 : vector<1x256xf32>
    %18 = arith.addf %12, %17 : vector<1x256xf32>
    %c0_9 = arith.constant 0 : index
    %c3 = arith.constant 3 : index
    %19 = memref.load %arg4[%c0_9, %c3] : memref<4x8xf32, #tpu.memory_space<smem>>
    %20 = vector.extract_strided_slice %0 {offsets = [0, 3, 0], sizes = [1, 1, 256], strides = [1, 1, 1]} : vector<1x4x256xf32> to vector<1x1x256xf32>
    %21 = vector.shape_cast %20 : vector<1x1x256xf32> to vector<1x256xf32>
    %22 = vector.broadcast %19 : f32 to vector<1x256xf32>
    %23 = arith.mulf %22, %21 : vector<1x256xf32>
    %24 = arith.addf %18, %23 : vector<1x256xf32>
    %c0_10 = arith.constant 0 : index
    %c4 = arith.constant 4 : index
    %25 = memref.load %arg4[%c0_10, %c4] : memref<4x8xf32, #tpu.memory_space<smem>>
    %26 = vector.extract_strided_slice %1 {offsets = [0, 0, 0], sizes = [1, 1, 256], strides = [1, 1, 1]} : vector<1x4x256xf32> to vector<1x1x256xf32>
    %27 = vector.shape_cast %26 : vector<1x1x256xf32> to vector<1x256xf32>
    %28 = vector.broadcast %25 : f32 to vector<1x256xf32>
    %29 = arith.mulf %28, %27 : vector<1x256xf32>
    %30 = arith.addf %24, %29 : vector<1x256xf32>
    %c0_11 = arith.constant 0 : index
    %c5 = arith.constant 5 : index
    %31 = memref.load %arg4[%c0_11, %c5] : memref<4x8xf32, #tpu.memory_space<smem>>
    %32 = vector.extract_strided_slice %1 {offsets = [0, 1, 0], sizes = [1, 1, 256], strides = [1, 1, 1]} : vector<1x4x256xf32> to vector<1x1x256xf32>
    %33 = vector.shape_cast %32 : vector<1x1x256xf32> to vector<1x256xf32>
    %34 = vector.broadcast %31 : f32 to vector<1x256xf32>
    %35 = arith.mulf %34, %33 : vector<1x256xf32>
    %36 = arith.addf %30, %35 : vector<1x256xf32>
    %c0_12 = arith.constant 0 : index
    %c6 = arith.constant 6 : index
    %37 = memref.load %arg4[%c0_12, %c6] : memref<4x8xf32, #tpu.memory_space<smem>>
    %38 = vector.extract_strided_slice %1 {offsets = [0, 2, 0], sizes = [1, 1, 256], strides = [1, 1, 1]} : vector<1x4x256xf32> to vector<1x1x256xf32>
    %39 = vector.shape_cast %38 : vector<1x1x256xf32> to vector<1x256xf32>
    %40 = vector.broadcast %37 : f32 to vector<1x256xf32>
    %41 = arith.mulf %40, %39 : vector<1x256xf32>
    %42 = arith.addf %36, %41 : vector<1x256xf32>
    %c0_13 = arith.constant 0 : index
    %c7 = arith.constant 7 : index
    %43 = memref.load %arg4[%c0_13, %c7] : memref<4x8xf32, #tpu.memory_space<smem>>
    %44 = vector.extract_strided_slice %1 {offsets = [0, 3, 0], sizes = [1, 1, 256], strides = [1, 1, 1]} : vector<1x4x256xf32> to vector<1x1x256xf32>
    %45 = vector.shape_cast %44 : vector<1x1x256xf32> to vector<1x256xf32>
    %46 = vector.broadcast %43 : f32 to vector<1x256xf32>
    %47 = arith.mulf %46, %45 : vector<1x256xf32>
    %48 = arith.addf %42, %47 : vector<1x256xf32>
    %c0_14 = arith.constant 0 : index
    %49 = memref.load %arg5[%c0_14] : memref<4xf32, #tpu.memory_space<smem>>
    %50 = vector.broadcast %49 : f32 to vector<1x256xf32>
    %51 = arith.addf %48, %50 : vector<1x256xf32>
    %c0_15 = arith.constant 0 : index
    %c0_16 = arith.constant 0 : index
    %c0_17 = arith.constant 0 : index
    %52 = vector.load %arg6[%c0_15, %c0_16, %c0_17] : memref<1x4x256xf32, #tpu.memory_space<vmem>>, vector<1x1x256xf32>
    %53 = vector.shape_cast %52 : vector<1x1x256xf32> to vector<1x256xf32>
    %54 = vector.shape_cast %51 : vector<1x256xf32> to vector<1x1x256xf32>
    tpu.vector_store %arg6[%c0_15, %c0_16, %c0_17], %54 {strides = array<i32>} : memref<1x4x256xf32, #tpu.memory_space<vmem>>, vector<1x1x256xf32>,
    %c1_18 = arith.constant 1 : index
    %c0_19 = arith.constant 0 : index
    %55 = memref.load %arg4[%c1_18, %c0_19] : memref<4x8xf32, #tpu.memory_space<smem>>
    %56 = vector.extract_strided_slice %0 {offsets = [0, 0, 0], sizes = [1, 1, 256], strides = [1, 1, 1]} : vector<1x4x256xf32> to vector<1x1x256xf32>
    %57 = vector.shape_cast %56 : vector<1x1x256xf32> to vector<1x256xf32>
    %58 = vector.broadcast %55 : f32 to vector<1x256xf32>
    %59 = arith.mulf %58, %57 : vector<1x256xf32>
    %c1_20 = arith.constant 1 : index
    %c1_21 = arith.constant 1 : index
    %60 = memref.load %arg4[%c1_20, %c1_21] : memref<4x8xf32, #tpu.memory_space<smem>>
    %61 = vector.extract_strided_slice %0 {offsets = [0, 1, 0], sizes = [1, 1, 256], strides = [1, 1, 1]} : vector<1x4x256xf32> to vector<1x1x256xf32>
    %62 = vector.shape_cast %61 : vector<1x1x256xf32> to vector<1x256xf32>
    %63 = vector.broadcast %60 : f32 to vector<1x256xf32>
    %64 = arith.mulf %63, %62 : vector<1x256xf32>
    %65 = arith.addf %59, %64 : vector<1x256xf32>
    %c1_22 = arith.constant 1 : index
    %c2_23 = arith.constant 2 : index
    %66 = memref.load %arg4[%c1_22, %c2_23] : memref<4x8xf32, #tpu.memory_space<smem>>
    %67 = vector.extract_strided_slice %0 {offsets = [0, 2, 0], sizes = [1, 1, 256], strides = [1, 1, 1]} : vector<1x4x256xf32> to vector<1x1x256xf32>
    %68 = vector.shape_cast %67 : vector<1x1x256xf32> to vector<1x256xf32>
    %69 = vector.broadcast %66 : f32 to vector<1x256xf32>
    %70 = arith.mulf %69, %68 : vector<1x256xf32>
    %71 = arith.addf %65, %70 : vector<1x256xf32>
    %c1_24 = arith.constant 1 : index
    %c3_25 = arith.constant 3 : index
    %72 = memref.load %arg4[%c1_24, %c3_25] : memref<4x8xf32, #tpu.memory_space<smem>>
    %73 = vector.extract_strided_slice %0 {offsets = [0, 3, 0], sizes = [1, 1, 256], strides = [1, 1, 1]} : vector<1x4x256xf32> to vector<1x1x256xf32>
    %74 = vector.shape_cast %73 : vector<1x1x256xf32> to vector<1x256xf32>
    %75 = vector.broadcast %72 : f32 to vector<1x256xf32>
    %76 = arith.mulf %75, %74 : vector<1x256xf32>
    %77 = arith.addf %71, %76 : vector<1x256xf32>
    %c1_26 = arith.constant 1 : index
    %c4_27 = arith.constant 4 : index
    %78 = memref.load %arg4[%c1_26, %c4_27] : memref<4x8xf32, #tpu.memory_space<smem>>
    %79 = vector.extract_strided_slice %1 {offsets = [0, 0, 0], sizes = [1, 1, 256], strides = [1, 1, 1]} : vector<1x4x256xf32> to vector<1x1x256xf32>
    %80 = vector.shape_cast %79 : vector<1x1x256xf32> to vector<1x256xf32>
    %81 = vector.broadcast %78 : f32 to vector<1x256xf32>
    %82 = arith.mulf %81, %80 : vector<1x256xf32>
    %83 = arith.addf %77, %82 : vector<1x256xf32>
    %c1_28 = arith.constant 1 : index
    %c5_29 = arith.constant 5 : index
    %84 = memref.load %arg4[%c1_28, %c5_29] : memref<4x8xf32, #tpu.memory_space<smem>>
    %85 = vector.extract_strided_slice %1 {offsets = [0, 1, 0], sizes = [1, 1, 256], strides = [1, 1, 1]} : vector<1x4x256xf32> to vector<1x1x256xf32>
    %86 = vector.shape_cast %85 : vector<1x1x256xf32> to vector<1x256xf32>
    %87 = vector.broadcast %84 : f32 to vector<1x256xf32>
    %88 = arith.mulf %87, %86 : vector<1x256xf32>
    %89 = arith.addf %83, %88 : vector<1x256xf32>
    %c1_30 = arith.constant 1 : index
    %c6_31 = arith.constant 6 : index
    %90 = memref.load %arg4[%c1_30, %c6_31] : memref<4x8xf32, #tpu.memory_space<smem>>
    %91 = vector.extract_strided_slice %1 {offsets = [0, 2, 0], sizes = [1, 1, 256], strides = [1, 1, 1]} : vector<1x4x256xf32> to vector<1x1x256xf32>
    %92 = vector.shape_cast %91 : vector<1x1x256xf32> to vector<1x256xf32>
    %93 = vector.broadcast %90 : f32 to vector<1x256xf32>
    %94 = arith.mulf %93, %92 : vector<1x256xf32>
    %95 = arith.addf %89, %94 : vector<1x256xf32>
    %c1_32 = arith.constant 1 : index
    %c7_33 = arith.constant 7 : index
    %96 = memref.load %arg4[%c1_32, %c7_33] : memref<4x8xf32, #tpu.memory_space<smem>>
    %97 = vector.extract_strided_slice %1 {offsets = [0, 3, 0], sizes = [1, 1, 256], strides = [1, 1, 1]} : vector<1x4x256xf32> to vector<1x1x256xf32>
    %98 = vector.shape_cast %97 : vector<1x1x256xf32> to vector<1x256xf32>
    %99 = vector.broadcast %96 : f32 to vector<1x256xf32>
    %100 = arith.mulf %99, %98 : vector<1x256xf32>
    %101 = arith.addf %95, %100 : vector<1x256xf32>
    %c1_34 = arith.constant 1 : index
    %102 = memref.load %arg5[%c1_34] : memref<4xf32, #tpu.memory_space<smem>>
    %103 = vector.broadcast %102 : f32 to vector<1x256xf32>
    %104 = arith.addf %101, %103 : vector<1x256xf32>
    %c0_35 = arith.constant 0 : index
    %c1_36 = arith.constant 1 : index
    %c0_37 = arith.constant 0 : index
    %105 = vector.load %arg6[%c0_35, %c1_36, %c0_37] : memref<1x4x256xf32, #tpu.memory_space<vmem>>, vector<1x1x256xf32>
    %106 = vector.shape_cast %105 : vector<1x1x256xf32> to vector<1x256xf32>
    %107 = vector.shape_cast %104 : vector<1x256xf32> to vector<1x1x256xf32>
    tpu.vector_store %arg6[%c0_35, %c1_36, %c0_37], %107 {strides = array<i32>} : memref<1x4x256xf32, #tpu.memory_space<vmem>>, vector<1x1x256xf32>,
    %c2_38 = arith.constant 2 : index
    %c0_39 = arith.constant 0 : index
    %108 = memref.load %arg4[%c2_38, %c0_39] : memref<4x8xf32, #tpu.memory_space<smem>>
    %109 = vector.extract_strided_slice %0 {offsets = [0, 0, 0], sizes = [1, 1, 256], strides = [1, 1, 1]} : vector<1x4x256xf32> to vector<1x1x256xf32>
    %110 = vector.shape_cast %109 : vector<1x1x256xf32> to vector<1x256xf32>
    %111 = vector.broadcast %108 : f32 to vector<1x256xf32>
    %112 = arith.mulf %111, %110 : vector<1x256xf32>
    %c2_40 = arith.constant 2 : index
    %c1_41 = arith.constant 1 : index
    %113 = memref.load %arg4[%c2_40, %c1_41] : memref<4x8xf32, #tpu.memory_space<smem>>
    %114 = vector.extract_strided_slice %0 {offsets = [0, 1, 0], sizes = [1, 1, 256], strides = [1, 1, 1]} : vector<1x4x256xf32> to vector<1x1x256xf32>
    %115 = vector.shape_cast %114 : vector<1x1x256xf32> to vector<1x256xf32>
    %116 = vector.broadcast %113 : f32 to vector<1x256xf32>
    %117 = arith.mulf %116, %115 : vector<1x256xf32>
    %118 = arith.addf %112, %117 : vector<1x256xf32>
    %c2_42 = arith.constant 2 : index
    %c2_43 = arith.constant 2 : index
    %119 = memref.load %arg4[%c2_42, %c2_43] : memref<4x8xf32, #tpu.memory_space<smem>>
    %120 = vector.extract_strided_slice %0 {offsets = [0, 2, 0], sizes = [1, 1, 256], strides = [1, 1, 1]} : vector<1x4x256xf32> to vector<1x1x256xf32>
    %121 = vector.shape_cast %120 : vector<1x1x256xf32> to vector<1x256xf32>
    %122 = vector.broadcast %119 : f32 to vector<1x256xf32>
    %123 = arith.mulf %122, %121 : vector<1x256xf32>
    %124 = arith.addf %118, %123 : vector<1x256xf32>
    %c2_44 = arith.constant 2 : index
    %c3_45 = arith.constant 3 : index
    %125 = memref.load %arg4[%c2_44, %c3_45] : memref<4x8xf32, #tpu.memory_space<smem>>
    %126 = vector.extract_strided_slice %0 {offsets = [0, 3, 0], sizes = [1, 1, 256], strides = [1, 1, 1]} : vector<1x4x256xf32> to vector<1x1x256xf32>
    %127 = vector.shape_cast %126 : vector<1x1x256xf32> to vector<1x256xf32>
    %128 = vector.broadcast %125 : f32 to vector<1x256xf32>
    %129 = arith.mulf %128, %127 : vector<1x256xf32>
    %130 = arith.addf %124, %129 : vector<1x256xf32>
    %c2_46 = arith.constant 2 : index
    %c4_47 = arith.constant 4 : index
    %131 = memref.load %arg4[%c2_46, %c4_47] : memref<4x8xf32, #tpu.memory_space<smem>>
    %132 = vector.extract_strided_slice %1 {offsets = [0, 0, 0], sizes = [1, 1, 256], strides = [1, 1, 1]} : vector<1x4x256xf32> to vector<1x1x256xf32>
    %133 = vector.shape_cast %132 : vector<1x1x256xf32> to vector<1x256xf32>
    %134 = vector.broadcast %131 : f32 to vector<1x256xf32>
    %135 = arith.mulf %134, %133 : vector<1x256xf32>
    %136 = arith.addf %130, %135 : vector<1x256xf32>
    %c2_48 = arith.constant 2 : index
    %c5_49 = arith.constant 5 : index
    %137 = memref.load %arg4[%c2_48, %c5_49] : memref<4x8xf32, #tpu.memory_space<smem>>
    %138 = vector.extract_strided_slice %1 {offsets = [0, 1, 0], sizes = [1, 1, 256], strides = [1, 1, 1]} : vector<1x4x256xf32> to vector<1x1x256xf32>
    %139 = vector.shape_cast %138 : vector<1x1x256xf32> to vector<1x256xf32>
    %140 = vector.broadcast %137 : f32 to vector<1x256xf32>
    %141 = arith.mulf %140, %139 : vector<1x256xf32>
    %142 = arith.addf %136, %141 : vector<1x256xf32>
    %c2_50 = arith.constant 2 : index
    %c6_51 = arith.constant 6 : index
    %143 = memref.load %arg4[%c2_50, %c6_51] : memref<4x8xf32, #tpu.memory_space<smem>>
    %144 = vector.extract_strided_slice %1 {offsets = [0, 2, 0], sizes = [1, 1, 256], strides = [1, 1, 1]} : vector<1x4x256xf32> to vector<1x1x256xf32>
    %145 = vector.shape_cast %144 : vector<1x1x256xf32> to vector<1x256xf32>
    %146 = vector.broadcast %143 : f32 to vector<1x256xf32>
    %147 = arith.mulf %146, %145 : vector<1x256xf32>
    %148 = arith.addf %142, %147 : vector<1x256xf32>
    %c2_52 = arith.constant 2 : index
    %c7_53 = arith.constant 7 : index
    %149 = memref.load %arg4[%c2_52, %c7_53] : memref<4x8xf32, #tpu.memory_space<smem>>
    %150 = vector.extract_strided_slice %1 {offsets = [0, 3, 0], sizes = [1, 1, 256], strides = [1, 1, 1]} : vector<1x4x256xf32> to vector<1x1x256xf32>
    %151 = vector.shape_cast %150 : vector<1x1x256xf32> to vector<1x256xf32>
    %152 = vector.broadcast %149 : f32 to vector<1x256xf32>
    %153 = arith.mulf %152, %151 : vector<1x256xf32>
    %154 = arith.addf %148, %153 : vector<1x256xf32>
    %c2_54 = arith.constant 2 : index
    %155 = memref.load %arg5[%c2_54] : memref<4xf32, #tpu.memory_space<smem>>
    %156 = vector.broadcast %155 : f32 to vector<1x256xf32>
    %157 = arith.addf %154, %156 : vector<1x256xf32>
    %c0_55 = arith.constant 0 : index
    %c2_56 = arith.constant 2 : index
    %c0_57 = arith.constant 0 : index
    %158 = vector.load %arg6[%c0_55, %c2_56, %c0_57] : memref<1x4x256xf32, #tpu.memory_space<vmem>>, vector<1x1x256xf32>
    %159 = vector.shape_cast %158 : vector<1x1x256xf32> to vector<1x256xf32>
    %160 = vector.shape_cast %157 : vector<1x256xf32> to vector<1x1x256xf32>
    tpu.vector_store %arg6[%c0_55, %c2_56, %c0_57], %160 {strides = array<i32>} : memref<1x4x256xf32, #tpu.memory_space<vmem>>, vector<1x1x256xf32>,
    %c3_58 = arith.constant 3 : index
    %c0_59 = arith.constant 0 : index
    %161 = memref.load %arg4[%c3_58, %c0_59] : memref<4x8xf32, #tpu.memory_space<smem>>
    %162 = vector.extract_strided_slice %0 {offsets = [0, 0, 0], sizes = [1, 1, 256], strides = [1, 1, 1]} : vector<1x4x256xf32> to vector<1x1x256xf32>
    %163 = vector.shape_cast %162 : vector<1x1x256xf32> to vector<1x256xf32>
    %164 = vector.broadcast %161 : f32 to vector<1x256xf32>
    %165 = arith.mulf %164, %163 : vector<1x256xf32>
    %c3_60 = arith.constant 3 : index
    %c1_61 = arith.constant 1 : index
    %166 = memref.load %arg4[%c3_60, %c1_61] : memref<4x8xf32, #tpu.memory_space<smem>>
    %167 = vector.extract_strided_slice %0 {offsets = [0, 1, 0], sizes = [1, 1, 256], strides = [1, 1, 1]} : vector<1x4x256xf32> to vector<1x1x256xf32>
    %168 = vector.shape_cast %167 : vector<1x1x256xf32> to vector<1x256xf32>
    %169 = vector.broadcast %166 : f32 to vector<1x256xf32>
    %170 = arith.mulf %169, %168 : vector<1x256xf32>
    %171 = arith.addf %165, %170 : vector<1x256xf32>
    %c3_62 = arith.constant 3 : index
    %c2_63 = arith.constant 2 : index
    %172 = memref.load %arg4[%c3_62, %c2_63] : memref<4x8xf32, #tpu.memory_space<smem>>
    %173 = vector.extract_strided_slice %0 {offsets = [0, 2, 0], sizes = [1, 1, 256], strides = [1, 1, 1]} : vector<1x4x256xf32> to vector<1x1x256xf32>
    %174 = vector.shape_cast %173 : vector<1x1x256xf32> to vector<1x256xf32>
    %175 = vector.broadcast %172 : f32 to vector<1x256xf32>
    %176 = arith.mulf %175, %174 : vector<1x256xf32>
    %177 = arith.addf %171, %176 : vector<1x256xf32>
    %c3_64 = arith.constant 3 : index
    %c3_65 = arith.constant 3 : index
    %178 = memref.load %arg4[%c3_64, %c3_65] : memref<4x8xf32, #tpu.memory_space<smem>>
    %179 = vector.extract_strided_slice %0 {offsets = [0, 3, 0], sizes = [1, 1, 256], strides = [1, 1, 1]} : vector<1x4x256xf32> to vector<1x1x256xf32>
    %180 = vector.shape_cast %179 : vector<1x1x256xf32> to vector<1x256xf32>
    %181 = vector.broadcast %178 : f32 to vector<1x256xf32>
    %182 = arith.mulf %181, %180 : vector<1x256xf32>
    %183 = arith.addf %177, %182 : vector<1x256xf32>
    %c3_66 = arith.constant 3 : index
    %c4_67 = arith.constant 4 : index
    %184 = memref.load %arg4[%c3_66, %c4_67] : memref<4x8xf32, #tpu.memory_space<smem>>
    %185 = vector.extract_strided_slice %1 {offsets = [0, 0, 0], sizes = [1, 1, 256], strides = [1, 1, 1]} : vector<1x4x256xf32> to vector<1x1x256xf32>
    %186 = vector.shape_cast %185 : vector<1x1x256xf32> to vector<1x256xf32>
    %187 = vector.broadcast %184 : f32 to vector<1x256xf32>
    %188 = arith.mulf %187, %186 : vector<1x256xf32>
    %189 = arith.addf %183, %188 : vector<1x256xf32>
    %c3_68 = arith.constant 3 : index
    %c5_69 = arith.constant 5 : index
    %190 = memref.load %arg4[%c3_68, %c5_69] : memref<4x8xf32, #tpu.memory_space<smem>>
    %191 = vector.extract_strided_slice %1 {offsets = [0, 1, 0], sizes = [1, 1, 256], strides = [1, 1, 1]} : vector<1x4x256xf32> to vector<1x1x256xf32>
    %192 = vector.shape_cast %191 : vector<1x1x256xf32> to vector<1x256xf32>
    %193 = vector.broadcast %190 : f32 to vector<1x256xf32>
    %194 = arith.mulf %193, %192 : vector<1x256xf32>
    %195 = arith.addf %189, %194 : vector<1x256xf32>
    %c3_70 = arith.constant 3 : index
    %c6_71 = arith.constant 6 : index
    %196 = memref.load %arg4[%c3_70, %c6_71] : memref<4x8xf32, #tpu.memory_space<smem>>
    %197 = vector.extract_strided_slice %1 {offsets = [0, 2, 0], sizes = [1, 1, 256], strides = [1, 1, 1]} : vector<1x4x256xf32> to vector<1x1x256xf32>
    %198 = vector.shape_cast %197 : vector<1x1x256xf32> to vector<1x256xf32>
    %199 = vector.broadcast %196 : f32 to vector<1x256xf32>
    %200 = arith.mulf %199, %198 : vector<1x256xf32>
    %201 = arith.addf %195, %200 : vector<1x256xf32>
    %c3_72 = arith.constant 3 : index
    %c7_73 = arith.constant 7 : index
    %202 = memref.load %arg4[%c3_72, %c7_73] : memref<4x8xf32, #tpu.memory_space<smem>>
    %203 = vector.extract_strided_slice %1 {offsets = [0, 3, 0], sizes = [1, 1, 256], strides = [1, 1, 1]} : vector<1x4x256xf32> to vector<1x1x256xf32>
    %204 = vector.shape_cast %203 : vector<1x1x256xf32> to vector<1x256xf32>
    %205 = vector.broadcast %202 : f32 to vector<1x256xf32>
    %206 = arith.mulf %205, %204 : vector<1x256xf32>
    %207 = arith.addf %201, %206 : vector<1x256xf32>
    %c3_74 = arith.constant 3 : index
    %208 = memref.load %arg5[%c3_74] : memref<4xf32, #tpu.memory_space<smem>>
    %209 = vector.broadcast %208 : f32 to vector<1x256xf32>
    %210 = arith.addf %207, %209 : vector<1x256xf32>
    %c0_75 = arith.constant 0 : index
    %c3_76 = arith.constant 3 : index
    %c0_77 = arith.constant 0 : index
    %211 = vector.load %arg6[%c0_75, %c3_76, %c0_77] : memref<1x4x256xf32, #tpu.memory_space<vmem>>, vector<1x1x256xf32>
    %212 = vector.shape_cast %211 : vector<1x1x256xf32> to vector<1x256xf32>
    %213 = vector.shape_cast %210 : vector<1x256xf32> to vector<1x1x256xf32>
    tpu.vector_store %arg6[%c0_75, %c3_76, %c0_77], %213 {strides = array<i32>} : memref<1x4x256xf32, #tpu.memory_space<vmem>>, vector<1x1x256xf32>,
    return
  }
  func.func @transform_0(%arg0: i32, %arg1: i32) -> (i32, i32, i32) {
    %c0_i32 = arith.constant 0 : i32
    %c0_i32_0 = arith.constant 0 : i32
    return %arg0, %c0_i32, %arg1 : i32, i32, i32
  }
  func.func @transform_1(%arg0: i32, %arg1: i32) -> (i32, i32, i32) {
    %c0_i32 = arith.constant 0 : i32
    %c0_i32_0 = arith.constant 0 : i32
    return %arg0, %c0_i32, %arg1 : i32, i32, i32
  }
  func.func @transform_2(%arg0: i32, %arg1: i32) -> (i32, i32) {
    %c0_i32 = arith.constant 0 : i32
    %c0_i32_0 = arith.constant 0 : i32
    %c0_i32_1 = arith.constant 0 : i32
    return %c0_i32, %c0_i32_0 : i32, i32
  }
  func.func @transform_3(%arg0: i32, %arg1: i32) -> i32 {
    %c0_i32 = arith.constant 0 : i32
    %c0_i32_0 = arith.constant 0 : i32
    return %c0_i32 : i32
  }
  func.func @transform_4(%arg0: i32, %arg1: i32) -> (i32, i32, i32) {
    %c0_i32 = arith.constant 0 : i32
    %c0_i32_0 = arith.constant 0 : i32
    return %arg0, %c0_i32, %arg1 : i32, i32, i32
  }
}

</mosaic_0001>

<bundles_post_ra>
// kernel: mixer_cell_decoder.1
= control target key start
LH: loop header
LB: loop body
LE: loop exit
PB: predicated region body
PF: predicated region fallthrough
CT: control target
= control target key end

     0   :  { %9 = vsyncpa [#allocation3], 0  ;;  %s1191_s0 = inlined_call_operand.vmem [shape: f32[2,4,256], index: 0, kind: input, shape index: {}]   ;;  %s1192_s1 = inlined_call_operand.vmem [shape: f32[2,4,256], index: 1, kind: input, shape index: {}]   ;;  %s1193_s2 = inlined_call_operand.vmem [shape: f32[4,8], index: 2, kind: input, shape index: {}]   ;;  %s1194_s3 = inlined_call_operand.vmem [shape: f32[4], index: 3, kind: input, shape index: {}]   ;;  %s1195_s4 = inlined_call_operand.vmem [shape: f32[2,4,256], index: 4, kind: output, shape index: {}]  }
   0x1   :  { %10 = vsyncpa [#allocation5], 0  ;;  %s953_s15 = smov 0   ;;  %s955_s16 = smov 0  }
   0x2   :  { %s957_s17 = smov 0  }
   0x3 LB: > { %s736_s18 = sadd.s32 4294967295, %s923_s17   ;;  %s28_s19 = sadd.s32 1, %s919_s16  ;;  %s923_s17 = sphi %s957_s17, %s16_s17   ;;  %s919_s16 = sphi %s955_s16, %s1207_s16   ;;  %s915_s15 = sphi %s953_s15, %s1206_s15  }
   0x4   : > { %p30_p0 = scmp.ge.s32.totalorder %s28_s19, 2  ;;  %p738_p1 = scmp.ge.s32.totalorder %s923_s17, 1 }
   0x5   : > { %p159_p2 = scmp.lt.s32.totalorder %s923_s17, 3  ;;  %p978_p4 = scmp.eq.s32.totalorder %s736_s18, 0 }
   0x6   : > { %s1209_s19 = smov (%p30_p0, %s28_s19), 0  ;;  %s172_s24 = sshll.u32 %s1193_s2, 4  ;;  %s173_s24 = int_to_ptr.vmem [resolvable:$true] %s172_s24 }
   0x7   : > { %p974_p3 = pnand %p738_p1, %p159_p2  ;;  %s183_s27 = sshll.u32 %s1194_s3, 4  ;;  %s184_s27 = int_to_ptr.vmem [resolvable:$true] %s183_s27 }
   0x8   : > { %s1200_s21 = scalar_select %p978_p4, 1, 0 }
   0x9   : > { %s1199_s20 = scalar_select %p974_p3, 1, 0 }
   0xa   : > { %p825_p5 = pneg %p974_p3  ;;  %s863_s29 = scalar_lea.vmem %s173_s24, 64 }
   0xb   : > { %p864_p7 = scmp.ne.s32.totalorder %s173_s24, %s863_s29  ;;  %p871_p11 = scmp.lt.s32.totalorder %s173_s24, %s173_s24 }
   0xc   : > { %p992_p6 = pnand %p978_p4, %p825_p5  ;;  %p872_p12 = scmp.lt.s32.totalorder %s863_s29, %s863_s29 }
   0xe   : > { %p865_p8 = pneg %p992_p6  ;;  %p873_p13 = por %p872_p12, %p871_p11 }
  0x10   : > { %p866_p9 = pnand %p865_p8, %p864_p7 }
  0x12   : > { %p867_p10 = pneg %p866_p9 }
  0x14   : > { %p874_p0 = pnand %p873_p13, %p867_p10 }
  0x16   : > { %877 = shalt.err (!%p874_p0)
}
  0x17   : > { %s925_s30 = smov [#allocation2]   ;;  %s878_s5 = scalar_lea.vmem %s184_s27, 16 }
  0x18   : > { %828 = dma.vmem_to_smem (!%p992_p6), %s173_s24, 64, %s925_s30, [#allocation3]  }
  0x19   : > { %p879_p1 = scmp.ne.s32.totalorder %s184_s27, %s878_s5  ;;  %p886_p4 = scmp.lt.s32.totalorder %s184_s27, %s184_s27 }
  0x1a   : > { %p887_p3 = scmp.lt.s32.totalorder %s878_s5, %s878_s5 }
  0x1b   : > { %p881_p2 = pnand %p879_p1, %p865_p8 }
  0x1c   : > { %p888_p7 = por %p887_p3, %p886_p4 }
  0x1d   : > { %p882_p5 = pneg %p881_p2 }
  0x1f   : > { %p889_p9 = pnand %p888_p7, %p882_p5 }
  0x21   : > { %892 = shalt.err (!%p889_p9)
}
  0x22   : > { %s926_s6 = smov [#allocation4]   ;;  %p1202_p10 = scmp.ne.s32.totalorder %s1199_s20, 0 }
  0x23   : > { %831 = dma.vmem_to_smem (!%p992_p6), %s184_s27, 16, %s926_s6, [#allocation5]  }
  0x24   : > { %222 = sbr.rel (%p1202_p10) target bundleno = 103 (0x67), region = 36  ;;  %p1203_p11 = scmp.ne.s32.totalorder (!%p1202_p10), %s1200_s21, 0 }
  0x2b   : > { %906 = dma.done.wait (%p1203_p11), [#allocation3], 64  }
  0x2c   : > { %908 = vsyncadd (%p1203_p11), [#allocation3], 4294967232 }
  0x2d   : > { %910 = dma.done.wait (%p1203_p11), [#allocation5], 16  }
  0x2e   : > { %912 = vsyncadd (%p1203_p11), [#allocation5], 4294967280 }
  0x2f   : > { %232 = sfence }
  0x30   : > { %p271_p3 = scmp.lt.s32.totalorder %s915_s15, 1  ;;  %s302_s7 = sld [smem:[#allocation2]]  ;;  %v927_v9 = vmov 1966171168   ;;  %v364_v11 = vlaneseq }
  0x31   : > { %s751_s8 = sld [smem:[#allocation2 + $0x1]]  ;;  %s753_s9 = sld [smem:[#allocation2 + $0x2]]  ;;  %v362_v10 = vunpack.c.l.s4 %v927_v9 }
  0x32   : > { %s1211_s15 = smov (!%p271_p3, %s915_s15), 1  ;;  %s755_s10 = sld [smem:[#allocation2 + $0x3]]  ;;  %v365_v24 = vshrl.u32 %v364_v11, 7  ;;  %vm1098_vm0 = vcmp.lt.s32.totalorder %v364_v11, 256 }
  0x33   : > { %s1014_s11 = sld [smem:[#allocation2 + $0x4]]  ;;  %s1016_s12 = sshll.u32 %s1211_s15, 3  ;;  %v363_v23 = vunpack.c.0.s8 %v362_v10 }
  0x34   : > { %s1018_s13 = sld [smem:[#allocation2 + $0x5]]  ;;  %s278_s20 = scalar_lea.vmem %s1191_s0, %s1016_s12 }
  0x35   : > { %s288_s23 = scalar_lea.vmem %s1192_s1, %s1016_s12  ;;  %v1028_v0 = vld [vmem:[%s278_s20] sm:$0xff]  ;;  %s760_s24 = sld [smem:[#allocation2 + $0x6]]  ;;  %v1088_v45 = vsub.s32 %v363_v23, %v365_v24 }
  0x36   : > { %v303_v1 = vstv %s302_s7  ;;  %s1030_s15 = sld [smem:[#allocation2 + $0x7]]  ;;  %s1035_s25 = sld [smem:[#allocation2 + $0x80]]  ;;  %v1039_v7 = vld [vmem:[%s288_s23] sm:$0xff] }
  0x37   : > { %v306_v2 = vstv %s751_s8  ;;  %v314_v3 = vstv %s753_s9  ;;  %v304_v4 = vmul.f32 %v303_v1, %v1028_v0  ;;  %s1037_s26 = sld [smem:[#allocation2 + $0x81]]  ;;  %s1041_s27 = sld [smem:[#allocation2 + $0x82]] }
  0x38   : > { %v307_v5 = vmul.f32 %v306_v2, %v1028_v0  ;;  %v315_v6 = vmul.f32 %v314_v3, %v1028_v0  ;;  %v322_v8 = vstv %s755_s10  ;;  %s1043_s28 = sld [smem:[#allocation2 + $0x83]]  ;;  %s1046_s29 = sld [smem:[#allocation2 + $0x84]] }
  0x39   : > { %v323_v14 = vmul.f32 %v322_v8, %v1028_v0  ;;  %s1048_s30 = sld [smem:[#allocation2 + $0x85]]  ;;  %v330_v15 = vstv %s1014_s11  ;;  %s1052_s5 = sld [smem:[#allocation2 + $0x86]] }
  0x3a   : > { %v752_v12 = vrot.slane %v307_v5, 9  ;;  %v754_v13 = vrot.slane %v315_v6, 10  ;;  %v334_v16 = vstv %s1018_s13  ;;  %s1054_s6 = sld [smem:[#allocation2 + $0x87]]  ;;  %s1059_s7 = sld [smem:[#allocation4]]  ;;  %v331_v26 = vmul.f32 %v330_v15, %v1039_v7 }
  0x3b   : > { %v756_v18 = vrot.slane %v323_v14, 11  ;;  %v335_v19 = vmul.f32 %v334_v16, %v1039_v7  ;;  %v342_v20 = vstv %s760_s24  ;;  %s1061_s8 = sld [smem:[#allocation2 + $0x100]]  ;;  %s1065_s9 = sld [smem:[#allocation2 + $0x101]] }
  0x3c   : > { %v312_v17 = vadd.f32 %v752_v12, %v304_v4  ;;  %v343_v21 = vmul.f32 %v342_v20, %v1039_v7  ;;  %v350_v22 = vstv %s1030_s15  ;;  %v382_v28 = vstv %s1035_s25  ;;  %s1070_s10 = sld [smem:[#allocation2 + $0x102]]  ;;  %s1072_s11 = sld [smem:[#allocation2 + $0x103]] }
  0x3d   : > { %v759_v27 = vrot.slane %v335_v19, 9  ;;  %v351_v30 = vmul.f32 %v350_v22, %v1039_v7  ;;  %v385_v31 = vstv %s1037_s26  ;;  %v393_v32 = vstv %s1041_s27  ;;  %s1077_s13 = sld [smem:[#allocation2 + $0x104]]  ;;  %s1083_s14 = sld [smem:[#allocation2 + $0x105]] }
  0x3e   : > { %v320_v25 = vadd.f32 %v754_v13, %v312_v17  ;;  %v761_v29 = vrot.slane %v343_v21, 10  ;;  %v383_v34 = vmul.f32 %v382_v28, %v1028_v0  ;;  %v386_v35 = vmul.f32 %v385_v31, %v1028_v0  ;;  %s1085_s18 = sld [smem:[#allocation2 + $0x106]]  ;;  %s1093_s20 = sld [smem:[#allocation4 + $0x1]] }
  0x3f   : > { %v394_v36 = vmul.f32 %v393_v32, %v1028_v0  ;;  %v401_v37 = vstv %s1043_s28  ;;  %v409_v38 = vstv %s1046_s29  ;;  %v413_v39 = vstv %s1048_s30  ;;  %s1095_s21 = sld [smem:[#allocation2 + $0x107]]  ;;  %s1105_s22 = sld [smem:[#allocation2 + $0x180]] }
  0x40   : > { %v328_v33 = vadd.f32 %v756_v18, %v320_v25  ;;  %v421_v40 = vstv %s1052_s5  ;;  %v766_v42 = vrot.slane %v386_v35, 9  ;;  %v402_v44 = vmul.f32 %v401_v37, %v1028_v0  ;;  %s1107_s23 = sld [smem:[#allocation2 + $0x181]]  ;;  %s1113_s24 = sld [smem:[#allocation2 + $0x182]] }
  0x41   : > { %v768_v43 = vrot.slane %v394_v36, 10  ;;  %v414_v46 = vmul.f32 %v413_v39, %v1039_v7  ;;  %v422_v47 = vmul.f32 %v421_v40, %v1039_v7  ;;  %v429_v48 = vstv %s1054_s6  ;;  %s1115_s15 = sld [smem:[#allocation2 + $0x183]]  ;;  %s1123_s25 = sld [smem:[#allocation2 + $0x184]] }
  0x42   : > { %v332_v41 = vadd.f32 %v331_v26, %v328_v33  ;;  %v763_v50 = vrot.slane %v351_v30, 11  ;;  %v391_v51 = vadd.f32 %v766_v42, %v383_v34  ;;  %v770_v52 = vrot.slane %v402_v44, 11  ;;  %s1125_s26 = sld [smem:[#allocation2 + $0x185]]  ;;  %s1130_s27 = sld [smem:[#allocation2 + $0x186]] }
  0x43   : > { %v358_v53 = vstv %s1059_s7  ;;  %v410_v55 = vmul.f32 %v409_v38, %v1039_v7  ;;  %v430_v56 = vmul.f32 %v429_v48, %v1039_v7  ;;  %v458_v57 = vstv %s1061_s8  ;;  %s1137_s30 = scalar_lea.vmem %s1195_s4, %s1016_s12  ;;  %s1143_s5 = sld [smem:[#allocation2 + $0x187]] }
  0x44   : > { %v340_v49 = vadd.f32 %v759_v27, %v332_v41  ;;  %v399_v59 = vadd.f32 %v768_v43, %v391_v51  ;;  %v773_v60 = vrot.slane %v414_v46, 9  ;;  %v775_v61 = vrot.slane %v422_v47, 10  ;;  %s1146_s6 = sld [smem:[#allocation4 + $0x2]]  ;;  %s810_s12 = sld [smem:[#allocation4 + $0x3]] }
  0x45   : > { %v459_v62 = vmul.f32 %v458_v57, %v1028_v0  ;;  %v461_v63 = vstv %s1065_s9  ;;  %v469_v1 = vstv %s1070_s10  ;;  %v477_v2 = vstv %s1072_s11 }
  0x46   : > { %v348_v58 = vadd.f32 %v761_v29, %v340_v49  ;;  %v407_v4 = vadd.f32 %v770_v52, %v399_v59  ;;  %v462_v5 = vmul.f32 %v461_v63, %v1028_v0  ;;  %v470_v6 = vmul.f32 %v469_v1, %v1028_v0 }
  0x47   : > { %v478_v8 = vmul.f32 %v477_v2, %v1028_v0  ;;  %v485_v9 = vstv %s1077_s13  ;;  %v489_v10 = vstv %s1083_s14  ;;  %v497_v11 = vstv %s1085_s18 }
  0x48   : > { %v356_v3 = vadd.f32 %v763_v50, %v348_v58  ;;  %v411_v13 = vadd.f32 %v410_v55, %v407_v4  ;;  %v782_v14 = vrot.slane %v462_v5, 9  ;;  %v784_v15 = vrot.slane %v470_v6, 10 }
  0x49   : > { %v777_v16 = vrot.slane %v430_v56, 11  ;;  %v437_v17 = vstv %s1093_s20  ;;  %v490_v18 = vmul.f32 %v489_v10, %v1039_v7  ;;  %v505_v19 = vstv %s1095_s21 }
  0x4a   : > { %v359_v12 = vadd.f32 %v358_v53, %v356_v3  ;;  %v419_v21 = vadd.f32 %v773_v60, %v411_v13  ;;  %v467_v22 = vadd.f32 %v782_v14, %v459_v62  ;;  %v786_v23 = vrot.slane %v478_v8, 11 }
  0x4b   : > { %v486_v24 = vmul.f32 %v485_v9, %v1039_v7  ;;  %v498_v25 = vmul.f32 %v497_v11, %v1039_v7  ;;  %v506_v26 = vmul.f32 %v505_v19, %v1039_v7  ;;  %v534_v27 = vstv %s1105_s22 }
  0x4c   : > { %v367_v20 = vrot.slane %v359_v12, %v1088_v45  ;;  %v427_v29 = vadd.f32 %v775_v61, %v419_v21  ;;  %v475_v30 = vadd.f32 %v784_v15, %v467_v22  ;;  %v789_v31 = vrot.slane %v490_v18, 9 }
  0x4d   : > { %v535_v32 = vmul.f32 %v534_v27, %v1028_v0  ;;  %v537_v33 = vstv %s1107_s23  ;;  %v545_v34 = vstv %s1113_s24  ;;  %v553_v35 = vstv %s1115_s15 }
  0x4e   : > { %v374_v28 = vrot.slane %v367_v20, %v1088_v45  ;;  %v435_v36 = vadd.f32 %v777_v16, %v427_v29  ;;  %v483_v37 = vadd.f32 %v786_v23, %v475_v30  ;;  %v538_v38 = vmul.f32 %v537_v33, %v1028_v0 }
  0x4f   : > { %v546_v39 = vmul.f32 %v545_v34, %v1028_v0  ;;  %v791_v40 = vrot.slane %v498_v25, 10  ;;  %v554_v41 = vmul.f32 %v553_v35, %v1028_v0  ;;  %v561_v42 = vstv %s1123_s25 }
  0x50   : > { %380 = vst.msk [vmem:[%s1137_s30] ss:$4 sm:$0x3] %vm1098_vm0, %v374_v28  ;;  %v565_v43 = vstv %s1125_s26  ;;  %v438_v44 = vadd.f32 %v437_v17, %v435_v36  ;;  %v487_v46 = vadd.f32 %v486_v24, %v483_v37  ;;  %v798_v47 = vrot.slane %v538_v38, 9 }
  0x51   : > { %v800_v48 = vrot.slane %v546_v39, 10  ;;  %v793_v49 = vrot.slane %v506_v26, 11  ;;  %v802_v50 = vrot.slane %v554_v41, 11  ;;  %v573_v51 = vstv %s1130_s27 }
  0x52   : > { %v446_v52 = vrot.slane %v438_v44, %v1088_v45  ;;  %v495_v53 = vadd.f32 %v789_v31, %v487_v46  ;;  %v543_v55 = vadd.f32 %v798_v47, %v535_v32  ;;  %v566_v56 = vmul.f32 %v565_v43, %v1039_v7 }
  0x53   : > { %v562_v57 = vmul.f32 %v561_v42, %v1039_v7  ;;  %v581_v0 = vstv %s1143_s5  ;;  %v574_v61 = vmul.f32 %v573_v51, %v1039_v7  ;;  %v513_v62 = vstv %s1146_s6 }
  0x54   : > { %v453_v58 = vrot.slane %v446_v52, %v1088_v45  ;;  %v503_v59 = vadd.f32 %v791_v40, %v495_v53  ;;  %v551_v60 = vadd.f32 %v800_v48, %v543_v55  ;;  %v805_v2 = vrot.slane %v566_v56, 9 }
  0x55   : > { %v582_v3 = vmul.f32 %v581_v0, %v1039_v7  ;;  %v807_v6 = vrot.slane %v574_v61, 10  ;;  %v589_v13 = vstv %s810_s12 }
  0x56   : > { %779 = vst.msk [vmem:[%s1137_s30 + $0x1] ss:$4 sm:$0x3] %vm1098_vm0, %v453_v58  ;;  %v511_v63 = vadd.f32 %v793_v49, %v503_v59  ;;  %v559_v1 = vadd.f32 %v802_v50, %v551_v60 }
  0x57   : > { %v809_v10 = vrot.slane %v582_v3, 11 }
  0x58   : > { %v514_v4 = vadd.f32 %v513_v62, %v511_v63  ;;  %v563_v5 = vadd.f32 %v562_v57, %v559_v1 }
  0x5a   : > { %v522_v8 = vrot.slane %v514_v4, %v1088_v45  ;;  %v571_v9 = vadd.f32 %v805_v2, %v563_v5 }
  0x5c   : > { %v529_v11 = vrot.slane %v522_v8, %v1088_v45  ;;  %v579_v12 = vadd.f32 %v807_v6, %v571_v9 }
  0x5e   : > { %795 = vst.msk [vmem:[%s1137_s30 + $0x2] ss:$4 sm:$0x3] %vm1098_vm0, %v529_v11  ;;  %v587_v14 = vadd.f32 %v809_v10, %v579_v12 }
  0x60   : > { %v590_v15 = vadd.f32 %v589_v13, %v587_v14 }
  0x62   : > { %v598_v16 = vrot.slane %v590_v15, %v1088_v45 }
  0x64   : > { %v605_v7 = vrot.slane %v598_v16, %v1088_v45 }
  0x66   : > { %811 = vst.msk [vmem:[%s1137_s30 + $0x3] ss:$4 sm:$0x3] %vm1098_vm0, %v605_v7 }
  0x67 PF: > { %s16_s17 = sadd.s32 1, %s923_s17   ;;  %s1206_s15 = smov %s919_s16 }
  0x68   : > { %p13_p4 = scmp.ge.s32.totalorder %s16_s17, 4   ;;  %s1207_s16 = smov %s1209_s19 }
  0x6a   :  { %15 = sbr.rel (!%p13_p4) target bundleno = 3 (0x3), region = 81 }
  0x71   :  { %639 = vsyncpa [#allocation3], 1 }
  0x72   :  { %641 = vsyncpa [#allocation3 + $0x1], 1 }
  0x73   :  { %642 = vsyncpa [#allocation5], 1 }

</bundles_post_ra>
